<compile_context>
chip_gen: v7x
topology: tpu7x:2x2x1
jax: 0.10.0
libtpu: 0.0.40
codegen_flags: <defaults>
</compile_context>

<pallas_src>
import functools

import jax
import jax.numpy as jnp
from jax.experimental import pallas as pl
from jax.experimental.pallas import tpu as pltpu

SUBLANE = 8            # f32 sublane multiple for the batch tile
OUT_PAD = 8            # 3 real output columns padded to 8 (full-dim block is legal)
MAX_BATCH_TILE = 2048  # per-step row cap; VMEM stays well under scoped limits


def _cdiv(a, b):
    return (a + b - 1) // b


def _round_up(n, m):
    return ((n + m - 1) // m) * m


def _num_tensorcores():
    """2 on v7x (megacore), 1 on v5e/v6e; safe fallback 1."""
    try:
        kind = jax.devices()[0].device_kind.lower()
    except Exception:
        return 1
    return 2 if "v7" in kind else 1


def _default_num_batch_tiles(batch_size, num_networks):
    # The fused online+target call already has 2 parallel "network" steps, and
    # tiny batches are not worth splitting.  Otherwise split the batch across
    # the available TensorCores (1 step on v5e/v6e, 2 on v7x).
    if num_networks >= 2 or batch_size < 16:
        return 1
    return _num_tensorcores()


# --------------------------------------------------------------------------
# Kernel: one batch tile of one network's full MLP.  Weights/biases for the
# current network are VMEM-resident (constant index_map across batch tiles).
# --------------------------------------------------------------------------
def _dqn_kernel(x_ref, w1_ref, b1_ref, w2_ref, b2_ref, w3_ref, b3_ref, o_ref):
    x = x_ref[0].astype(jnp.bfloat16)                       # (tb, K) bf16
    h1 = jnp.dot(x, w1_ref[0],
                 preferred_element_type=jnp.float32) + b1_ref[0]
    h1 = jnp.maximum(h1, 0.0)                                # f32 VPU
    h2 = jnp.dot(h1.astype(jnp.bfloat16), w2_ref[0],
                 preferred_element_type=jnp.float32) + b2_ref[0]
    h2 = jnp.maximum(h2, 0.0)
    o_ref[0] = jnp.dot(h2.astype(jnp.bfloat16), w3_ref[0],
                       preferred_element_type=jnp.float32) + b3_ref[0]


@functools.partial(jax.jit, static_argnames=("out_features", "num_batch_tiles"))
def _dqn_forward_impl(x, w1, b1, w2, b2, w3, b3, *, out_features,
                      num_batch_tiles):
    """x: (n_net, B, K) f32; weights stacked with a leading n_net axis."""
    n_net, B, K = x.shape
    H = w1.shape[2]
    OUTP = w3.shape[2]

    # Number of batch tiles: respect the requested parallel split, cap tile
    # rows at MAX_BATCH_TILE, never create tiles of pure padding.
    nb = max(num_batch_tiles, _cdiv(B, MAX_BATCH_TILE))
    nb = max(1, min(nb, _cdiv(B, SUBLANE)))
    tb = _round_up(_cdiv(B, nb), SUBLANE)
    b_pad = tb * nb

    # Skip the pad entirely for aligned batches (common 32/64/128/256 sizes).
    if b_pad != B:
        xp = jnp.zeros((n_net, b_pad, K), x.dtype).at[:, :B, :].set(x)
    else:
        xp = x

    grid = (n_net, nb)
    flops = 2 * n_net * b_pad * (K * H + H * H + H * OUTP)
    bytes_accessed = (
        4 * xp.size
        + 2 * (w1.size + w2.size + w3.size)        # bf16 weights
        + 4 * (b1.size + b2.size + b3.size)        # f32 biases
        + 4 * n_net * b_pad * OUTP                 # f32 output
    )

    out = pl.pallas_call(
        _dqn_kernel,
        out_shape=jax.ShapeDtypeStruct((n_net, b_pad, OUTP), jnp.float32),
        grid=grid,
        in_specs=[
            pl.BlockSpec((1, tb, K), lambda n, i: (n, i, 0)),      # x tiles stream
            pl.BlockSpec((1, K, H), lambda n, i: (n, 0, 0)),       # W1 resident
            pl.BlockSpec((1, 1, H), lambda n, i: (n, 0, 0)),       # b1 resident
            pl.BlockSpec((1, H, H), lambda n, i: (n, 0, 0)),       # W2 resident
            pl.BlockSpec((1, 1, H), lambda n, i: (n, 0, 0)),       # b2 resident
            pl.BlockSpec((1, H, OUTP), lambda n, i: (n, 0, 0)),    # W3 resident
            pl.BlockSpec((1, 1, OUTP), lambda n, i: (n, 0, 0)),    # b3 resident
        ],
        out_specs=pl.BlockSpec((1, tb, OUTP), lambda n, i: (n, i, 0)),
        compiler_params=pltpu.CompilerParams(
            dimension_semantics=("parallel", "parallel"),
        ),
        cost_estimate=pl.CostEstimate(
            flops=flops, transcendentals=0, bytes_accessed=bytes_accessed,
        ),
    )(xp, w1, b1, w2, b2, w3, b3)

    return out[:, :B, :out_features]


# --------------------------------------------------------------------------
# Parameter preparation (one-time, outside the hot path).
# --------------------------------------------------------------------------
def prepare_params(params):
    """Cast weights to bf16, pad W3/b3 to OUT_PAD columns, add a leading
    network axis of size 1.  Biases stay f32."""
    w1, b1 = params["w1"], params["b1"].reshape(1, -1)
    w2, b2 = params["w2"], params["b2"].reshape(1, -1)
    w3, b3 = params["w3"], params["b3"].reshape(1, -1)
    h = w1.shape[1]
    out = w3.shape[1]
    out_pad = max(OUT_PAD, _round_up(out, SUBLANE))
    w3p = jnp.zeros((h, out_pad), jnp.float32).at[:, :out].set(w3)
    b3p = jnp.zeros((1, out_pad), jnp.float32).at[:, :out].set(b3)
    return {
        "w1": w1.astype(jnp.bfloat16)[None],
        "b1": b1.astype(jnp.float32)[None],
        "w2": w2.astype(jnp.bfloat16)[None],
        "b2": b2.astype(jnp.float32)[None],
        "w3": w3p.astype(jnp.bfloat16)[None],
        "b3": b3p.astype(jnp.float32)[None],
        "out_features": out,
    }


def stack_prepared(p_a, p_b):
    """Stack two prepared parameter sets (e.g. online + target network)."""
    assert p_a["out_features"] == p_b["out_features"]
    stacked = {k: jnp.concatenate([p_a[k], p_b[k]], axis=0)
               for k in ("w1", "b1", "w2", "b2", "w3", "b3")}
    stacked["out_features"] = p_a["out_features"]
    return stacked


# --------------------------------------------------------------------------
# Public forwards.
# --------------------------------------------------------------------------
def dqn_forward(x, prepared, num_batch_tiles=None):
    """x: [B, input_size] f32; prepared: prepare_params(...) of one network."""
    p = prepared
    if num_batch_tiles is None:
        num_batch_tiles = _default_num_batch_tiles(x.shape[0], p["w1"].shape[0])
    out = _dqn_forward_impl(
        x[None], p["w1"], p["b1"], p["w2"], p["b2"], p["w3"], p["b3"],
        out_features=p["out_features"], num_batch_tiles=num_batch_tiles)
    return out[0]


def dqn_forward_pair(x_online, x_target, prepared_pair, num_batch_tiles=None):
    """Fused Q(s; theta) and Q(s'; theta_minus) in a single pallas_call.

    prepared_pair = stack_prepared(prepare_params(online), prepare_params(target)).
    """
    if x_online.shape != x_target.shape:
        raise ValueError("online/target batches must have identical shapes")
    p = prepared_pair
    if num_batch_tiles is None:
        num_batch_tiles = _default_num_batch_tiles(x_online.shape[0], 2)
    x = jnp.stack([x_online, x_target], axis=0)
    out = _dqn_forward_impl(
        x, p["w1"], p["b1"], p["w2"], p["b2"], p["w3"], p["b3"],
        out_features=p["out_features"], num_batch_tiles=num_batch_tiles)
    return out[0], out[1]


# --------------------------------------------------------------------------
# Init + reference (for the self-test).
# --------------------------------------------------------------------------
def init_params(key, input_size=6, hidden_size=128, out_size=3):
    """nn.Linear-style uniform(-1/sqrt(fan_in), +1/sqrt(fan_in)) init.
    Weights are stored already transposed to [in, out] for the kernel."""
    ks = jax.random.split(key, 6)

    def lin(kw, kb, fan_in, fan_out):
        bound = 1.0 / jnp.sqrt(jnp.float32(fan_in))
        w = jax.random.uniform(kw, (fan_in, fan_out), jnp.float32, -bound, bound)
        b = jax.random.uniform(kb, (1, fan_out), jnp.float32, -bound, bound)
        return w, b

    w1, b1 = lin(ks[0], ks[1], input_size, hidden_size)
    w2, b2 = lin(ks[2], ks[3], hidden_size, hidden_size)
    w3, b3 = lin(ks[4], ks[5], hidden_size, out_size)
    return {"w1": w1, "b1": b1, "w2": w2, "b2": b2, "w3": w3, "b3": b3}


def _reference(x, params):
    h1 = jnp.maximum(x @ params["w1"] + params["b1"], 0.0)
    h2 = jnp.maximum(h1 @ params["w2"] + params["b2"], 0.0)
    return h2 @ params["w3"] + params["b3"]


if __name__ == "__main__":
    key = jax.random.PRNGKey(0)
    k_online, k_target, k_x, k_xr, k_xs = jax.random.split(key, 5)

    input_size, hidden_size = 6, 128
    online_raw = init_params(k_online, input_size, hidden_size)
    target_raw = init_params(k_target, input_size, hidden_size)
    online = prepare_params(online_raw)
    target = prepare_params(target_raw)
    pair = stack_prepared(online, target)

    # bf16 MXU operands (f32 accumulation) -> loose tolerance vs f32 reference.
    TOL = dict(atol=5e-2, rtol=5e-2)

    # Replay-minibatch forward through the online network (grid: 1 step on
    # v5e/v6e, 2 "parallel" batch tiles on v7x).
    x = jax.random.normal(k_x, (32, input_size), jnp.float32)
    q = jax.block_until_ready(dqn_forward(x, online))
    assert q.shape == (32, 3)
    assert jnp.allclose(q, _reference(x, online_raw), **TOL)

    # Ragged batch: rows padded to a sublane multiple inside, sliced back off.
    xr = jax.random.normal(k_xr, (5, input_size), jnp.float32)
    qr = jax.block_until_ready(dqn_forward(xr, online))
    assert qr.shape == (5, 3)
    assert jnp.allclose(qr, _reference(xr, online_raw), **TOL)

    # Fused online + target forward: one pallas_call, both weight sets stacked
    # along the leading "network" grid axis.
    xs = jax.random.normal(k_xs, (32, input_size), jnp.float32)
    q_on, q_tg = dqn_forward_pair(x, xs, pair)
    jax.block_until_ready((q_on, q_tg))
    assert q_on.shape == (32, 3) and q_tg.shape == (32, 3)
    assert jnp.allclose(q_on, _reference(x, online_raw), **TOL)
    assert jnp.allclose(q_tg, _reference(xs, target_raw), **TOL)

    print("KERNEL_OK")
</pallas_src>

<mosaic_0001>
module attributes {stable_mosaic.version = 11 : i64} {
  func.func @_dqn_kernel(%arg0: i32, %arg1: i32, %arg2: memref<1x32x6xf32, #tpu.memory_space<vmem>>, %arg3: memref<1x6x128xbf16, #tpu.memory_space<vmem>>, %arg4: memref<1x1x128xf32, #tpu.memory_space<vmem>>, %arg5: memref<1x128x128xbf16, #tpu.memory_space<vmem>>, %arg6: memref<1x1x128xf32, #tpu.memory_space<vmem>>, %arg7: memref<1x128x8xbf16, #tpu.memory_space<vmem>>, %arg8: memref<1x1x8xf32, #tpu.memory_space<vmem>>, %arg9: memref<1x32x8xf32, #tpu.memory_space<vmem>>) attributes {dimension_semantics = [#tpu.dimension_semantics<parallel>, #tpu.dimension_semantics<parallel>], iteration_bounds = array<i64: 1, 1>, scalar_prefetch = 0 : i64, scratch_operands = 0 : i64, tpu.core_type = #tpu.core_type<tc>, window_params = [{transform_indices = @transform_0, window_bounds = array<i64: 1, 32, 6>}, {transform_indices = @transform_1, window_bounds = array<i64: 1, 6, 128>}, {transform_indices = @transform_2, window_bounds = array<i64: 1, 1, 128>}, {transform_indices = @transform_3, window_bounds = array<i64: 1, 128, 128>}, {transform_indices = @transform_4, window_bounds = array<i64: 1, 1, 128>}, {transform_indices = @transform_5, window_bounds = array<i64: 1, 128, 8>}, {transform_indices = @transform_6, window_bounds = array<i64: 1, 1, 8>}, {transform_indices = @transform_7, window_bounds = array<i64: 1, 32, 8>}]} {
    %c0 = arith.constant 0 : index
    %c0_0 = arith.constant 0 : index
    %c0_1 = arith.constant 0 : index
    %0 = vector.load %arg2[%c0, %c0_0, %c0_1] : memref<1x32x6xf32, #tpu.memory_space<vmem>>, vector<1x32x6xf32>
    %1 = vector.shape_cast %0 : vector<1x32x6xf32> to vector<32x6xf32>
    %2 = arith.truncf %1 : vector<32x6xf32> to vector<32x6xbf16>
    %c0_2 = arith.constant 0 : index
    %c0_3 = arith.constant 0 : index
    %c0_4 = arith.constant 0 : index
    %3 = vector.load %arg3[%c0_2, %c0_3, %c0_4] : memref<1x6x128xbf16, #tpu.memory_space<vmem>>, vector<1x6x128xbf16>
    %4 = vector.shape_cast %3 : vector<1x6x128xbf16> to vector<6x128xbf16>
    %cst = arith.constant dense<0.000000e+00> : vector<32x128xf32>
    %5 = tpu.matmul %2, %4, %cst {dimension_numbers = #tpu.dot_dimension_numbers<[1], [0], [0], [1], [0, 0, 1, 1], [], []>} : vector<32x6xbf16>, vector<6x128xbf16>, vector<32x128xf32> -> vector<32x128xf32>
    %c0_5 = arith.constant 0 : index
    %c0_6 = arith.constant 0 : index
    %c0_7 = arith.constant 0 : index
    %6 = vector.load %arg4[%c0_5, %c0_6, %c0_7] : memref<1x1x128xf32, #tpu.memory_space<vmem>>, vector<1x1x128xf32>
    %7 = vector.shape_cast %6 : vector<1x1x128xf32> to vector<1x128xf32>
    %8 = vector.broadcast %7 : vector<1x128xf32> to vector<32x128xf32>
    %9 = arith.addf %5, %8 : vector<32x128xf32>
    %cst_8 = arith.constant 0.000000e+00 : f32
    %10 = vector.broadcast %cst_8 : f32 to vector<32x128xf32>
    %11 = arith.maximumf %9, %10 : vector<32x128xf32>
    %12 = arith.truncf %11 : vector<32x128xf32> to vector<32x128xbf16>
    %c0_9 = arith.constant 0 : index
    %c0_10 = arith.constant 0 : index
    %c0_11 = arith.constant 0 : index
    %13 = vector.load %arg5[%c0_9, %c0_10, %c0_11] : memref<1x128x128xbf16, #tpu.memory_space<vmem>>, vector<1x128x128xbf16>
    %14 = vector.shape_cast %13 : vector<1x128x128xbf16> to vector<128x128xbf16>
    %cst_12 = arith.constant dense<0.000000e+00> : vector<32x128xf32>
    %15 = tpu.matmul %12, %14, %cst_12 {dimension_numbers = #tpu.dot_dimension_numbers<[1], [0], [0], [1], [0, 0, 1, 1], [], []>} : vector<32x128xbf16>, vector<128x128xbf16>, vector<32x128xf32> -> vector<32x128xf32>
    %c0_13 = arith.constant 0 : index
    %c0_14 = arith.constant 0 : index
    %c0_15 = arith.constant 0 : index
    %16 = vector.load %arg6[%c0_13, %c0_14, %c0_15] : memref<1x1x128xf32, #tpu.memory_space<vmem>>, vector<1x1x128xf32>
    %17 = vector.shape_cast %16 : vector<1x1x128xf32> to vector<1x128xf32>
    %18 = vector.broadcast %17 : vector<1x128xf32> to vector<32x128xf32>
    %19 = arith.addf %15, %18 : vector<32x128xf32>
    %cst_16 = arith.constant 0.000000e+00 : f32
    %20 = vector.broadcast %cst_16 : f32 to vector<32x128xf32>
    %21 = arith.maximumf %19, %20 : vector<32x128xf32>
    %22 = arith.truncf %21 : vector<32x128xf32> to vector<32x128xbf16>
    %c0_17 = arith.constant 0 : index
    %c0_18 = arith.constant 0 : index
    %c0_19 = arith.constant 0 : index
    %23 = vector.load %arg7[%c0_17, %c0_18, %c0_19] : memref<1x128x8xbf16, #tpu.memory_space<vmem>>, vector<1x128x8xbf16>
    %24 = vector.shape_cast %23 : vector<1x128x8xbf16> to vector<128x8xbf16>
    %cst_20 = arith.constant dense<0.000000e+00> : vector<32x8xf32>
    %25 = tpu.matmul %22, %24, %cst_20 {dimension_numbers = #tpu.dot_dimension_numbers<[1], [0], [0], [1], [0, 0, 1, 1], [], []>} : vector<32x128xbf16>, vector<128x8xbf16>, vector<32x8xf32> -> vector<32x8xf32>
    %c0_21 = arith.constant 0 : index
    %c0_22 = arith.constant 0 : index
    %c0_23 = arith.constant 0 : index
    %26 = vector.load %arg8[%c0_21, %c0_22, %c0_23] : memref<1x1x8xf32, #tpu.memory_space<vmem>>, vector<1x1x8xf32>
    %27 = vector.shape_cast %26 : vector<1x1x8xf32> to vector<1x8xf32>
    %28 = vector.broadcast %27 : vector<1x8xf32> to vector<32x8xf32>
    %29 = arith.addf %25, %28 : vector<32x8xf32>
    %c0_24 = arith.constant 0 : index
    %c0_25 = arith.constant 0 : index
    %c0_26 = arith.constant 0 : index
    %30 = vector.load %arg9[%c0_24, %c0_25, %c0_26] : memref<1x32x8xf32, #tpu.memory_space<vmem>>, vector<1x32x8xf32>
    %31 = vector.shape_cast %30 : vector<1x32x8xf32> to vector<32x8xf32>
    %32 = vector.shape_cast %29 : vector<32x8xf32> to vector<1x32x8xf32>
    tpu.vector_store %arg9[%c0_24, %c0_25, %c0_26], %32 {strides = array<i32>} : memref<1x32x8xf32, #tpu.memory_space<vmem>>, vector<1x32x8xf32>,
    return
  }
  func.func @transform_0(%arg0: i32, %arg1: i32) -> (i32, i32, i32) {
    %c0_i32 = arith.constant 0 : i32
    %c0_i32_0 = arith.constant 0 : i32
    return %arg0, %arg1, %c0_i32 : i32, i32, i32
  }
  func.func @transform_1(%arg0: i32, %arg1: i32) -> (i32, i32, i32) {
    %c0_i32 = arith.constant 0 : i32
    %c0_i32_0 = arith.constant 0 : i32
    %c0_i32_1 = arith.constant 0 : i32
    return %arg0, %c0_i32, %c0_i32_0 : i32, i32, i32
  }
  func.func @transform_2(%arg0: i32, %arg1: i32) -> (i32, i32, i32) {
    %c0_i32 = arith.constant 0 : i32
    %c0_i32_0 = arith.constant 0 : i32
    %c0_i32_1 = arith.constant 0 : i32
    return %arg0, %c0_i32, %c0_i32_0 : i32, i32, i32
  }
  func.func @transform_3(%arg0: i32, %arg1: i32) -> (i32, i32, i32) {
    %c0_i32 = arith.constant 0 : i32
    %c0_i32_0 = arith.constant 0 : i32
    %c0_i32_1 = arith.constant 0 : i32
    return %arg0, %c0_i32, %c0_i32_0 : i32, i32, i32
  }
  func.func @transform_4(%arg0: i32, %arg1: i32) -> (i32, i32, i32) {
    %c0_i32 = arith.constant 0 : i32
    %c0_i32_0 = arith.constant 0 : i32
    %c0_i32_1 = arith.constant 0 : i32
    return %arg0, %c0_i32, %c0_i32_0 : i32, i32, i32
  }
  func.func @transform_5(%arg0: i32, %arg1: i32) -> (i32, i32, i32) {
    %c0_i32 = arith.constant 0 : i32
    %c0_i32_0 = arith.constant 0 : i32
    %c0_i32_1 = arith.constant 0 : i32
    return %arg0, %c0_i32, %c0_i32_0 : i32, i32, i32
  }
  func.func @transform_6(%arg0: i32, %arg1: i32) -> (i32, i32, i32) {
    %c0_i32 = arith.constant 0 : i32
    %c0_i32_0 = arith.constant 0 : i32
    %c0_i32_1 = arith.constant 0 : i32
    return %arg0, %c0_i32, %c0_i32_0 : i32, i32, i32
  }
  func.func @transform_7(%arg0: i32, %arg1: i32) -> (i32, i32, i32) {
    %c0_i32 = arith.constant 0 : i32
    %c0_i32_0 = arith.constant 0 : i32
    return %arg0, %arg1, %c0_i32 : i32, i32, i32
  }
}

</mosaic_0001>

<bundles_post_ra>
// kernel: _dqn_forward_impl.1
= control target key start
LH: loop header
LB: loop body
LE: loop exit
PB: predicated region body
PF: predicated region fallthrough
CT: control target
= control target key end

     0   :  { %vm48_vm0 = vcmask 1042432   ;;  %vm41_vm1 = vcmask 48128   ;;  %vm353_vm2 = vcmask 64512   ;;  %s593_s1 = inlined_call_operand.vmem [shape: bf16[1,6,128], index: 1, kind: input, shape index: {}]   ;;  %s594_s0 = inlined_call_operand.vmem [shape: f32[1,32,6], index: 0, kind: input, shape index: {}]   ;;  %s595_s3 = inlined_call_operand.vmem [shape: bf16[1,128,128], index: 3, kind: input, shape index: {}]   ;;  %s596_s5 = inlined_call_operand.vmem [shape: bf16[1,128,8], index: 5, kind: input, shape index: {}]   ;;  %s597_s2 = inlined_call_operand.vmem [shape: f32[1,1,128], index: 2, kind: input, shape index: {}]   ;;  %s598_s4 = inlined_call_operand.vmem [shape: f32[1,1,128], index: 4, kind: input, shape index: {}]   ;;  %s599_s6 = inlined_call_operand.vmem [shape: f32[1,1,8], index: 6, kind: input, shape index: {}]   ;;  %s600_s7 = inlined_call_operand.vmem [shape: f32[1,32,8], index: 7, kind: output, shape index: {}]  }
   0x1   :  { %v33_v0 = vld [vmem:[%s593_s1] sm:$0x7]  ;;  %v28_v2 = vld [vmem:[%s594_s0 + $0x8] sm:$0xff]  ;;  %v29_v5 = vld [vmem:[%s594_s0 + $0x10] sm:$0xff] }
   0x2   :  { %v27_v1 = vld [vmem:[%s594_s0] sm:$0xff]  ;;  %452 = vmatprep.subr.msk.bf16.mxu0 %vm48_vm0, %v33_v0  ;;  %v50_v3 = vsel %vm48_vm0, %v33_v0, 0  ;;  %v30_v6 = vld [vmem:[%s594_s0 + $0x18] sm:$0xff]  ;;  %v454_v9 = vld [vmem:[%s595_s3 + $0x8] sm:$0xff]  }
   0x3   :  { %v31_v4 = vpack.c.bf16 %v28_v2, %v27_v1  ;;  %407 = vmatpush3.bf16.msra.mxu0 %v50_v3  ;;  %v32_v7 = vpack.c.bf16 %v30_v6, %v29_v5  ;;  %v453_v8 = vld [vmem:[%s595_s3] sm:$0xff]   ;;  %v455_v10 = vld [vmem:[%s595_s3 + $0x10] sm:$0xff]   ;;  %v456_v11 = vld [vmem:[%s595_s3 + $0x18] sm:$0xff]  }
   0x4   :  { %412 = vmatprep.subr.bf16.mxu1 %v453_v8  ;;  %v457_v12 = vld [vmem:[%s595_s3 + $0x20] sm:$0xff]   ;;  %v458_v13 = vld [vmem:[%s595_s3 + $0x28] sm:$0xff]   ;;  %v459_v14 = vld [vmem:[%s595_s3 + $0x30] sm:$0xff]  }
   0x5   :  { %408 = vmatprep.mubr.msk.bf16.mxu0 %vm41_vm1, %v31_v4  ;;  %413 = vmatpush3.bf16.msra.mxu1 %v453_v8  ;;  %v460_v15 = vld [vmem:[%s595_s3 + $0x38] sm:$0xff]   ;;  %v461_v16 = vld [vmem:[%s596_s5] sm:$0xff]   ;;  %v462_v17 = vld [vmem:[%s596_s5 + $0x8] sm:$0xff]  }
   0x6   :  { %409 = vmatmul.mubr.msk.bf16.vlgmr.msra.gmra.mrb[0].mxu0 %vm41_vm1, %v32_v7  ;;  %414 = vmatprep.subr.bf16.mxu1 %v454_v9  ;;  %v463_v18 = vld [vmem:[%s596_s5 + $0x10] sm:$0xff]   ;;  %v464_v19 = vld [vmem:[%s596_s5 + $0x18] sm:$0xff]   ;;  %v465_v20 = vld [vmem:[%s596_s5 + $0x20] sm:$0xff]  }
   0x7   :  { %432 = vmatprep.subr.bf16.mxu0 %v461_v16  ;;  %v466_v21 = vld [vmem:[%s596_s5 + $0x28] sm:$0xff]   ;;  %v362_v22 = vld [vmem:[%s597_s2] ss:$0 sm:$0xff]  ;;  %v467_v37 = vld [vmem:[%s596_s5 + $0x30] sm:$0xff]  }
   0x8   :  { %433 = vmatpush3.bf16.msra.mxu0 %v461_v16  ;;  %v468_v38 = vld [vmem:[%s596_s5 + $0x38] sm:$0xff]   ;;  %v365_v39 = vld [vmem:[%s598_s4] ss:$0 sm:$0xff] }
   0x9   :  { %415 = vmatpush3.bf16.msra.mxu1 %v454_v9  ;;  %434 = vmatprep.subr.bf16.mxu0 %v462_v17  ;;  %v374_v54 = vld [vmem:[%s599_s6] ss:$0 sm:$0xff] }
   0xa   :  { %416 = vmatprep.subr.bf16.mxu1 %v455_v10 }
   0xc   :  { %435 = vmatpush3.bf16.msra.mxu0 %v462_v17 }
   0xd   :  { %417 = vmatpush3.bf16.msra.mxu1 %v455_v10  ;;  %436 = vmatprep.subr.bf16.mxu0 %v463_v18 }
   0xe   :  { %418 = vmatprep.subr.bf16.mxu1 %v456_v11 }
  0x10   :  { %437 = vmatpush3.bf16.msra.mxu0 %v463_v18 }
  0x11   :  { %419 = vmatpush3.bf16.msra.mxu1 %v456_v11  ;;  %438 = vmatprep.subr.bf16.mxu0 %v464_v19 }
  0x12   :  { %420 = vmatprep.subr.bf16.mxu1 %v457_v12 }
  0x14   :  { %439 = vmatpush3.bf16.msra.mxu0 %v464_v19 }
  0x15   :  { %421 = vmatpush3.bf16.msra.mxu1 %v457_v12  ;;  %440 = vmatprep.subr.bf16.mxu0 %v465_v20 }
  0x16   :  { %422 = vmatprep.subr.bf16.mxu1 %v458_v13 }
  0x18   :  { %441 = vmatpush3.bf16.msra.mxu0 %v465_v20 }
  0x19   :  { %423 = vmatpush3.bf16.msra.mxu1 %v458_v13  ;;  %442 = vmatprep.subr.bf16.mxu0 %v466_v21 }
  0x1a   :  { %424 = vmatprep.subr.bf16.mxu1 %v459_v14 }
  0x1c   :  { %443 = vmatpush3.bf16.msra.mxu0 %v466_v21 }
  0x1d   :  { %425 = vmatpush3.bf16.msra.mxu1 %v459_v14  ;;  %444 = vmatprep.subr.bf16.mxu0 %v467_v37 }
  0x1e   :  { %426 = vmatprep.subr.bf16.mxu1 %v460_v15 }
  0x20   :  { %445 = vmatpush3.bf16.msra.mxu0 %v467_v37 }
  0x21   :  { %427 = vmatpush3.bf16.msra.mxu1 %v460_v15  ;;  %446 = vmatprep.subr.bf16.mxu0 %v468_v38 }
  0x24   :  { %447 = vmatpush3.bf16.msra.mxu0 %v468_v38 }
  0xd9   :  { %v410_v23 = vpop.f32.mrb[0].mxu0 }
  0xda   :  { %v95_v24 = vadd.f32 %v410_v23, %v362_v22  ;;  %v86_v25 = vpop.f32.mrb[1].mxu0 }
  0xdb   :  { %v87_v26 = vadd.f32 %v362_v22, %v86_v25  ;;  %v411_v27 = vpop.f32.mrb[2].mxu0 }
  0xdc   :  { %v98_v28 = vadd.f32 %v411_v27, %v362_v22  ;;  %v89_v29 = vpop.f32.mrb[3].mxu0  ;;  %v103_v31 = vmax.f32 %v95_v24, 0.0 }
  0xdd   :  { %v90_v30 = vadd.f32 %v362_v22, %v89_v29  ;;  %v101_v33 = vmax.f32 %v87_v26, 0.0 }
  0xde   :  { %v104_v32 = vmax.f32 %v98_v28, 0.0 }
  0xdf   :  { %v102_v34 = vmax.f32 %v90_v30, 0.0 }
  0xe0   :  { %v106_v35 = vpack.c.bf16 %v104_v32, %v103_v31 }
  0xe1   :  { %v105_v36 = vpack.c.bf16 %v102_v34, %v101_v33 }
  0xe3   :  { %428 = vmatprep.mubr.bf16.mxu1 %v105_v36 }
  0xe4   :  { %429 = vmatmul.mubr.bf16.vlgmr.msra.gmra.mrb[0].mxu1 %v106_v35 }
 0x1b7   :  { %v430_v40 = vpop.f32.mrb[0].mxu1 }
 0x1b8   :  { %v221_v41 = vadd.f32 %v430_v40, %v365_v39  ;;  %v212_v42 = vpop.f32.mrb[1].mxu1 }
 0x1b9   :  { %v213_v43 = vadd.f32 %v365_v39, %v212_v42  ;;  %v431_v44 = vpop.f32.mrb[2].mxu1 }
 0x1ba   :  { %v224_v45 = vadd.f32 %v431_v44, %v365_v39  ;;  %v215_v46 = vpop.f32.mrb[3].mxu1  ;;  %v229_v48 = vmax.f32 %v221_v41, 0.0 }
 0x1bb   :  { %v216_v47 = vadd.f32 %v365_v39, %v215_v46  ;;  %v227_v50 = vmax.f32 %v213_v43, 0.0 }
 0x1bc   :  { %v230_v49 = vmax.f32 %v224_v45, 0.0 }
 0x1bd   :  { %v228_v51 = vmax.f32 %v216_v47, 0.0 }
 0x1be   :  { %v232_v52 = vpack.c.bf16 %v230_v49, %v229_v48 }
 0x1bf   :  { %v231_v53 = vpack.c.bf16 %v228_v51, %v227_v50 }
 0x1c1   :  { %448 = vmatprep.mubr.bf16.mxu0 %v231_v53 }
 0x1c2   :  { %449 = vmatmul.mubr.bf16.vlgmr.msra.gmra.mrb[4].mxu0 %v232_v52 }
 0x295   :  { %v450_v55 = vpop.f32.mrb[4].mxu0 }
 0x296   :  { %v347_v56 = vadd.f32 %v450_v55, %v374_v54  ;;  %v338_v57 = vpop.f32.mrb[5].mxu0 }
 0x297   :  { %v339_v58 = vadd.f32 %v374_v54, %v338_v57  ;;  %v451_v59 = vpop.f32.mrb[6].mxu0 }
 0x298   :  { %356 = vst.msk [vmem:[%s600_s7 + $0x10] sm:$0xff] %vm353_vm2, %v347_v56  ;;  %v350_v60 = vadd.f32 %v451_v59, %v374_v54  ;;  %v341_v61 = vpop.f32.mrb[7].mxu0 }
 0x299   :  { %354 = vst.msk [vmem:[%s600_s7] sm:$0xff] %vm353_vm2, %v339_v58  ;;  %v342_v62 = vadd.f32 %v374_v54, %v341_v61 }
 0x29a   :  { %357 = vst.msk [vmem:[%s600_s7 + $0x18] sm:$0xff] %vm353_vm2, %v350_v60 }
 0x29b   :  { %355 = vst.msk [vmem:[%s600_s7 + $0x8] sm:$0xff] %vm353_vm2, %v342_v62 }

</bundles_post_ra>
